<compile_context>
chip_gen: v6e
topology: v6e:2x2x1
jax: 0.10.0
libtpu: 0.0.40
codegen_flags: <defaults>
</compile_context>

<pallas_src>
import functools

import jax
import jax.numpy as jnp
from jax.experimental import pallas as pl
from jax.experimental.pallas import tpu as pltpu

_LANE = 128   # vreg lane width
_SUB = 8      # vreg sublane width
_MAX_TM = 512  # big batch tiles amortize the ~0.35 us/step pipeline overhead


def _round_up(v, m):
    return ((v + m - 1) // m) * m


def _pick_tm(b_pad8, max_tile=_MAX_TM):
    """Pick a batch tile (multiple of 8) that minimizes zero-row padding.

    When the whole batch fits in one tile, split into two equal tiles if that
    costs no extra padding, so v7x's second TensorCore gets work from the
    "parallel" grid axis (v5e/v6e, 1 TC, are unaffected).
    """
    if b_pad8 <= max_tile:
        if b_pad8 >= 2 * _SUB and b_pad8 % (2 * _SUB) == 0:
            return b_pad8 // 2
        return b_pad8
    best_tm, best_total = _SUB, None
    for tm in range(max_tile, _SUB - 1, -_SUB):
        total = pl.cdiv(b_pad8, tm) * tm
        if best_total is None or total < best_total:
            best_tm, best_total = tm, total
        if total == b_pad8:  # perfect fit at the largest tile size
            break
    return best_tm


def neuralnet_kernel(x_ref, w3_ref, b3_ref, o_ref):
    """One batch tile of y = x @ W3 + b3 (W3/b3 stay resident across the grid)."""
    y = jnp.dot(x_ref[...], w3_ref[...], preferred_element_type=jnp.float32)
    o_ref[...] = (y + b3_ref[...]).astype(o_ref.dtype)


def pad_l3_params(w3, b3):
    """Zero-pad W3/b3 columns to a lane-dense multiple of 128.

    Call ONCE at init (hoisted out of the per-step forward) so padding never
    adds a per-call HBM round trip over the weight matrix.
    """
    num_classes = w3.shape[1]
    n_pad = _round_up(max(num_classes, _LANE), _LANE)
    if n_pad != num_classes:
        w3 = jnp.pad(w3, ((0, 0), (0, n_pad - num_classes)))
        b3 = jnp.pad(b3, ((0, 0), (0, n_pad - num_classes)))
    return w3, b3, num_classes


@functools.partial(jax.jit, static_argnames=("num_classes",))
def neuralnet_forward_prepared(x, w3p, b3p, *, num_classes):
    """Forward with pre-padded l3 params (preferred, padding hoisted to init)."""
    batch, in_features = x.shape
    k = in_features
    n_pad = w3p.shape[1]

    # Batch tiling: multiple of 8, up to _MAX_TM rows, minimal zero padding.
    b_pad8 = _round_up(max(batch, _SUB), _SUB)
    tm = _pick_tm(b_pad8)
    b_pad = pl.cdiv(b_pad8, tm) * tm

    xp = x if b_pad == batch else jnp.pad(x, ((0, b_pad - batch), (0, 0)))

    grid = (b_pad // tm,)
    itemsize = jnp.dtype(jnp.float32).itemsize
    cost = pl.CostEstimate(
        flops=2 * b_pad * k * n_pad,
        transcendentals=0,
        bytes_accessed=(xp.size + w3p.size + b3p.size + b_pad * n_pad)
        * itemsize,
    )

    # Double-buffered VMEM footprint: x/out streamed, w3/b3 resident.
    vmem_needed = 2 * itemsize * (tm * k + k * n_pad + n_pad + tm * n_pad)
    # TODO(synk): on v7x (64 MiB VMEM) single-buffer the resident w3/b3 via
    # pipeline_mode=pl.Buffered(1), or split K onto an "arbitrary" grid axis
    # with a f32 VMEM accumulator, if in_features grows past the scoped limit.
    if vmem_needed > (30 << 20):
        compiler_params = pltpu.CompilerParams(
            dimension_semantics=("parallel",),
            vmem_limit_bytes=min(vmem_needed + (4 << 20), 64 << 20),
        )
    else:
        compiler_params = pltpu.CompilerParams(
            dimension_semantics=("parallel",))

    out = pl.pallas_call(
        neuralnet_kernel,
        out_shape=jax.ShapeDtypeStruct((b_pad, n_pad), jnp.float32),
        grid=grid,
        in_specs=[
            # x: streamed per batch tile (double-buffered by the pipeline).
            pl.BlockSpec((tm, k), lambda i: (i, 0)),
            # w3 / b3: constant index_map -> stay resident in VMEM.
            pl.BlockSpec((k, n_pad), lambda i: (0, 0)),
            pl.BlockSpec((1, n_pad), lambda i: (0, 0)),
        ],
        out_specs=pl.BlockSpec((tm, n_pad), lambda i: (i, 0)),
        compiler_params=compiler_params,
        cost_estimate=cost,
    )(xp, w3p, b3p)

    if b_pad != batch or n_pad != num_classes:
        out = out[:batch, :num_classes]
    return out


def neuralnet_forward(x, w1, b1, w2, b2, w3, b3):
    """API-parity forward. The relu(l1(x)) / relu(l2(x)) intermediates in the
    reference module are overwritten before being returned, so their
    parameters are intentionally unused (no DMA, no MXU work).

    Prefer pad_l3_params + neuralnet_forward_prepared in a training/serving
    loop so the weight padding is not redone every call.
    """
    del w1, b1, w2, b2  # dead branches in the reference forward
    w3p, b3p, num_classes = pad_l3_params(w3, b3)
    return neuralnet_forward_prepared(x, w3p, b3p, num_classes=num_classes)


def init_linear_params(key, in_features, out_features):
    """Deterministic init mimicking nn.Linear's uniform(-1/sqrt(in), 1/sqrt(in))."""
    kw, kb = jax.random.split(key)
    bound = 1.0 / jnp.sqrt(jnp.float32(in_features))
    # Stored as [in, out] (transpose of PyTorch's [out, in]) for x @ W.
    w = jax.random.uniform(kw, (in_features, out_features), jnp.float32,
                           -bound, bound)
    b = jax.random.uniform(kb, (1, out_features), jnp.float32, -bound, bound)
    return w, b


if __name__ == "__main__":
    batch = 8
    input_size = 32
    hidden_size = 64
    num_classes = 16

    key = jax.random.PRNGKey(0)
    kx, k1, k2, k3 = jax.random.split(key, 4)

    x = jax.random.normal(kx, (batch, input_size), jnp.float32)
    w1, b1 = init_linear_params(k1, input_size, hidden_size)
    w2, b2 = init_linear_params(k2, input_size, hidden_size)
    w3, b3 = init_linear_params(k3, input_size, num_classes)

    # Hoisted (one-time) weight padding, then the jitted forward.
    w3p, b3p, nc = pad_l3_params(w3, b3)
    out = neuralnet_forward_prepared(x, w3p, b3p, num_classes=nc)
    out = jax.block_until_ready(out)

    # Also exercise the API-parity wrapper once.
    out2 = jax.block_until_ready(neuralnet_forward(x, w1, b1, w2, b2, w3, b3))

    # Reference check in plain JAX (same math as the PyTorch module: only
    # l3(x) reaches the return value).
    ref = x @ w3 + b3
    assert out.shape == (batch, num_classes)
    assert jnp.allclose(out, ref, atol=1e-5, rtol=1e-5)
    assert jnp.allclose(out2, ref, atol=1e-5, rtol=1e-5)

    print("KERNEL_OK")
</pallas_src>

<mosaic_0001>
module attributes {stable_mosaic.version = 11 : i64} {
  func.func @neuralnet_kernel(%arg0: i32, %arg1: memref<8x32xf32, #tpu.memory_space<vmem>>, %arg2: memref<32x128xf32, #tpu.memory_space<vmem>>, %arg3: memref<1x128xf32, #tpu.memory_space<vmem>>, %arg4: memref<8x128xf32, #tpu.memory_space<vmem>>) attributes {dimension_semantics = [#tpu.dimension_semantics<parallel>], iteration_bounds = array<i64: 1>, scalar_prefetch = 0 : i64, scratch_operands = 0 : i64, tpu.core_type = #tpu.core_type<tc>, window_params = [{transform_indices = @transform_0, window_bounds = array<i64: 8, 32>}, {pipeline_mode = #tpu.pipeline_mode<synchronous>, transform_indices = @transform_1, window_bounds = array<i64: 32, 128>}, {pipeline_mode = #tpu.pipeline_mode<synchronous>, transform_indices = @transform_2, window_bounds = array<i64: 1, 128>}, {transform_indices = @transform_3, window_bounds = array<i64: 8, 128>}]} {
    %c0 = arith.constant 0 : index
    %c0_0 = arith.constant 0 : index
    %0 = vector.load %arg1[%c0, %c0_0] : memref<8x32xf32, #tpu.memory_space<vmem>>, vector<8x32xf32>
    %c0_1 = arith.constant 0 : index
    %c0_2 = arith.constant 0 : index
    %1 = vector.load %arg2[%c0_1, %c0_2] : memref<32x128xf32, #tpu.memory_space<vmem>>, vector<32x128xf32>
    %cst = arith.constant dense<0.000000e+00> : vector<8x128xf32>
    %2 = tpu.matmul %0, %1, %cst {dimension_numbers = #tpu.dot_dimension_numbers<[1], [0], [0], [1], [0, 0, 1, 1], [], []>} : vector<8x32xf32>, vector<32x128xf32>, vector<8x128xf32> -> vector<8x128xf32>
    %c0_3 = arith.constant 0 : index
    %c0_4 = arith.constant 0 : index
    %3 = vector.load %arg3[%c0_3, %c0_4] : memref<1x128xf32, #tpu.memory_space<vmem>>, vector<1x128xf32>
    %4 = vector.broadcast %3 : vector<1x128xf32> to vector<8x128xf32>
    %5 = arith.addf %2, %4 : vector<8x128xf32>
    %c0_5 = arith.constant 0 : index
    %c0_6 = arith.constant 0 : index
    %6 = vector.load %arg4[%c0_5, %c0_6] : memref<8x128xf32, #tpu.memory_space<vmem>>, vector<8x128xf32>
    tpu.vector_store %arg4[%c0_5, %c0_6], %5 {strides = array<i32>} : memref<8x128xf32, #tpu.memory_space<vmem>>, vector<8x128xf32>,
    return
  }
  func.func @transform_0(%arg0: i32) -> (i32, i32) {
    %c0_i32 = arith.constant 0 : i32
    %c0_i32_0 = arith.constant 0 : i32
    return %arg0, %c0_i32 : i32, i32
  }
  func.func @transform_1(%arg0: i32) -> (i32, i32) {
    %c0_i32 = arith.constant 0 : i32
    %c0_i32_0 = arith.constant 0 : i32
    %c0_i32_1 = arith.constant 0 : i32
    return %c0_i32, %c0_i32_0 : i32, i32
  }
  func.func @transform_2(%arg0: i32) -> (i32, i32) {
    %c0_i32 = arith.constant 0 : i32
    %c0_i32_0 = arith.constant 0 : i32
    %c0_i32_1 = arith.constant 0 : i32
    return %c0_i32, %c0_i32_0 : i32, i32
  }
  func.func @transform_3(%arg0: i32) -> (i32, i32) {
    %c0_i32 = arith.constant 0 : i32
    %c0_i32_0 = arith.constant 0 : i32
    return %arg0, %c0_i32 : i32, i32
  }
}

</mosaic_0001>

<bundles_post_ra>
// kernel: neuralnet_forward_prepared.1
= control target key start
LH: loop header
LB: loop body
LE: loop exit
PB: predicated region body
PF: predicated region fallthrough
CT: control target
= control target key end

     0   :  { %8 = vsyncpa [#allocation3], 0  ;;  %s274_s0 = inlined_call_operand.hbm [shape: f32[8,32], index: 0, kind: input, shape index: {}]   ;;  %s275_s1 = inlined_call_operand.hbm [shape: f32[32,128], index: 1, kind: input, shape index: {}]   ;;  %s276_s2 = inlined_call_operand.vmem [shape: f32[1,128], index: 2, kind: input, shape index: {}]   ;;  %s277_s3 = inlined_call_operand.hbm [shape: f32[8,128], index: 3, kind: output, shape index: {}]  }
   0x1   :  { %9 = vsyncpa [#allocation6], 0 }
   0x2   :  { %10 = vsyncpa [#allocation4], 0  ;;  %s235_s12 = smov [#allocation2]   ;;  %s236_s14 = smov [#allocation5]  }
   0x3   :  { %s17_s13 = sshll.u32 %s235_s12, 4  ;;  %s26_s15 = sshll.u32 %s236_s14, 4  ;;  %s18_s13 = int_to_ptr.vmem [resolvable:$true] %s17_s13  ;;  %s27_s15 = int_to_ptr.vmem [resolvable:$true] %s26_s15 }
   0x4   :  { %s177_s16 = scalar_lea.vmem %s18_s13, 128  ;;  %p182_p1 = scmp.lt.s32.totalorder %s18_s13, %s18_s13 }
   0x5   :  { %p178_p0 = scmp.ne.s32.totalorder %s18_s13, %s177_s16  ;;  %p183_p2 = scmp.lt.s32.totalorder %s177_s16, %s177_s16 }
   0x7   :  { %p184_p3 = por %p183_p2, %p182_p1 }
   0x9   :  { %p185_p4 = pnand %p184_p3, %p178_p0 }
   0xb   :  { %188 = shalt.err (!%p185_p4)
}
   0xc   :  { %20 = dma.hbm_to_vmem [thread:$0]  %s274_s0, 128, %s18_s13, [#allocation3]  }
   0xd   :  { %s197_s19 = scalar_lea.vmem %s27_s15, 512  ;;  %p202_p6 = scmp.lt.s32.totalorder %s27_s15, %s27_s15 }
   0xe   :  { %p198_p5 = scmp.ne.s32.totalorder %s27_s15, %s197_s19  ;;  %p203_p7 = scmp.lt.s32.totalorder %s197_s19, %s197_s19 }
  0x10   :  { %p204_p8 = por %p203_p7, %p202_p6 }
  0x12   :  { %p205_p9 = pnand %p204_p8, %p198_p5 }
  0x14   :  { %208 = shalt.err (!%p205_p9)
}
  0x15   :  { %s237_s20 = smov 128   ;;  %s238_s21 = smov 8  }
  0x16   :  { %32 = dma.hbm_to_vmem [thread:$0]  %s275_s1, 512, %s27_s15, [#allocation6], %s237_s20, %s237_s20, %s238_s21  }
  0x17   :  { %229 = dma.done.wait [#allocation3], 128  }
  0x18   :  { %230 = vsyncadd [#allocation3], 4294967168 }
  0x19   :  { %231 = dma.done.wait [#allocation6], 512  }
  0x1a   :  { %232 = vsyncadd [#allocation6], 4294966784  ;;  %v239_v0 = vmov 0.0   ;;  %vm240_vm0 = vmmov 0   ;;  %v45_v1 = vld [vmem:[#allocation5 + $0x18] sm:$0xff]  ;;  %v44_v2 = vld [vmem:[#allocation5 + $0x10] sm:$0xff] }
  0x1b   :  { %151 = vmatprep.subr.mxu0 %v239_v0  ;;  %159 = vmatprep.mubr.msk.f32.mxu0 %vm240_vm0, %v239_v0  ;;  %v43_v3 = vld [vmem:[#allocation5 + $0x8] sm:$0xff]  ;;  %v42_v4 = vld [vmem:[#allocation5] sm:$0xff]  ;;  %v41_v5 = vld [vmem:[#allocation2] sm:$0xff]  ;;  %vm53_vm1 = vcmask 261120   ;;  %s241_s24 = smov [#allocation7]  }
  0x1c   :  { %152 = vmatpush3.msra.mxu0 %v45_v1  ;;  %v144_v6 = vld [vmem:[%s276_s2] ss:$0 sm:$0xff]  ;;  %s134_s25 = sshll.u32 %s241_s24, 4  ;;  %s135_s25 = int_to_ptr.vmem [resolvable:$true] %s134_s25 }
  0x1d   :  { %153 = vmatprep.subr.mxu0 %v239_v0  ;;  %s209_s26 = scalar_lea.vmem %s135_s25, 128  ;;  %p214_p11 = scmp.lt.s32.totalorder %s135_s25, %s135_s25 }
  0x1e   :  { %154 = vmatpush3.msra.mxu0 %v44_v2  ;;  %p210_p10 = scmp.ne.s32.totalorder %s135_s25, %s209_s26  ;;  %p215_p12 = scmp.lt.s32.totalorder %s209_s26, %s209_s26 }
  0x1f   :  { %155 = vmatprep.subr.mxu0 %v239_v0 }
  0x20   :  { %156 = vmatpush3.msra.mxu0 %v43_v3  ;;  %p216_p13 = por %p215_p12, %p214_p11 }
  0x21   :  { %157 = vmatprep.subr.mxu0 %v239_v0 }
  0x22   :  { %158 = vmatpush3.msra.mxu0 %v42_v4  ;;  %p217_p0 = pnand %p216_p13, %p210_p10 }
  0x23   :  { %160 = vmatmul.mubr.msk.f32.vlgmr.msra.gmra.mxu0 %vm53_vm1, %v41_v5 }
  0xe3   :  { %v123_v7 = vpop.f32.mrf.mxu0 }
  0xe4   :  { %v124_v8 = vadd.f32 %v144_v6, %v123_v7 }
  0xe5   :  { %v161_v9 = vpop.f32.mrf.mxu0 }
  0xe6   :  { %127 = vst [vmem:[#allocation7] sm:$0xff] %v124_v8 }
  0xe7   :  { %220 = shalt.err (!%p217_p0)
}
  0xe8   :  { %137 = dma.vmem_to_hbm [thread:$0]  %s135_s25, 128, %s277_s3, [#allocation4]  }
  0xe9   :  { %233 = dma.done.wait [#allocation4], 128  }
  0xea   :  { %234 = vsyncadd [#allocation4], 4294967168 }
  0xeb   :  { %141 = vsyncpa [#allocation3], 1 }
  0xec   :  { %142 = vsyncpa [#allocation6], 1 }
  0xed   :  { %143 = vsyncpa [#allocation4], 1 }

</bundles_post_ra>
